<compile_context>
chip_gen: v7x
topology: tpu7x:2x2x1
jax: 0.10.0
libtpu: 0.0.40
codegen_flags: <defaults>
</compile_context>

<pallas_src>
import jax
import jax.numpy as jnp
from jax.experimental import pallas as pl
from jax.experimental.pallas import tpu as pltpu


def _twinq_kernel(sa_ref,
                  w1t_ref, b1t_ref,
                  w2t_ref, b2t_ref,
                  w3t_ref, b3t_ref,
                  out_ref):
    """min(q1, q2) for one batch tile; fully feature-major, twin heads fused."""
    sa = sa_ref[...]                                            # (K, TB) bf16

    # Layer 1: (F, K) @ (K, TB) -> (F, TB).  ReLU/bias in f32, cast for the MXU.
    h = jnp.dot(w1t_ref[...], sa, preferred_element_type=jnp.float32)
    h = jnp.maximum(h + b1t_ref[...], 0.0).astype(jnp.bfloat16)

    # Layer 2 (block-diagonal across the two heads): (F, F) @ (F, TB).
    h = jnp.dot(w2t_ref[...], h, preferred_element_type=jnp.float32)
    h = jnp.maximum(h + b2t_ref[...], 0.0).astype(jnp.bfloat16)

    # Layer 3: (2, F) @ (F, TB) -> row 0 = q1, row 1 = q2 (batch on lanes).
    qt = jnp.dot(w3t_ref[...], h, preferred_element_type=jnp.float32)
    qt = qt + b3t_ref[...]                                      # (2, TB) f32

    # Elementwise minimum of the two rows on the VPU (no XLU reduction).
    out_ref[...] = jnp.minimum(qt[0:1, :], qt[1:2, :]).astype(out_ref.dtype)


def twinq_forward(state, action, packed_params, *, batch_tile=512):
    """TwinQ forward: returns min(q1, q2) with shape (B,)."""
    assert batch_tile % 128 == 0, "batch_tile must be a multiple of 128"
    B = state.shape[0]
    w1t, b1t, w2t, b2t, w3t, b3t = packed_params
    F, K = w1t.shape                      # fused hidden width (padded), Ds+Da

    # Clamp the tile for small batches, then pad batch to a tile multiple.
    bt = min(batch_tile, ((B + 127) // 128) * 128)
    Bp = ((B + bt - 1) // bt) * bt

    # Single pre-packed feature-major input (one DMA stream, lane-dense).
    sa_t = jnp.concatenate([state, action], axis=1).T.astype(jnp.bfloat16)
    if Bp != B:
        sa_t = jnp.pad(sa_t, ((0, 0), (0, Bp - B)))             # (K, Bp)

    full = lambda shape: pl.BlockSpec(shape, lambda i: (0, 0))  # resident weights

    itemsize = lambda a: a.size * a.dtype.itemsize
    cost = pl.CostEstimate(
        flops=2 * Bp * F * (K + F + 2),
        transcendentals=0,
        bytes_accessed=itemsize(sa_t) + sum(itemsize(p) for p in packed_params)
        + Bp * 4,
    )

    out = pl.pallas_call(
        _twinq_kernel,
        out_shape=jax.ShapeDtypeStruct((1, Bp), jnp.float32),
        grid_spec=pltpu.PrefetchScalarGridSpec(
            num_scalar_prefetch=0,
            grid=(Bp // bt,),
            in_specs=[
                pl.BlockSpec((K, bt), lambda i: (0, i)),        # saT tile
                full((F, K)), full((F, 1)),                     # layer 1 (bf16 / f32)
                full((F, F)), full((F, 1)),                     # layer 2
                full((2, F)), full((2, 1)),                     # layer 3
            ],
            out_specs=pl.BlockSpec((1, bt), lambda i: (0, i)),  # lane-dense output
        ),
        compiler_params=pltpu.CompilerParams(
            dimension_semantics=("parallel",)),
        cost_estimate=cost,
    )(sa_t, w1t, b1t, w2t, b2t, w3t, b3t)

    return out[0, :B]  # Squeeze(-1) + drop batch padding


def pack_twinq_params(raw_params):
    """Fuse the two heads, go feature-major, cast weights to bf16.

    raw_params: (w1a, b1a, w2a, b2a, w3a, b3a, w1b, b1b, w2b, b2b, w3b, b3b)
    with weights stored as (in_features, out_features), biases as (1, out_features).
    """
    (w1a, b1a, w2a, b2a, w3a, b3a,
     w1b, b1b, w2b, b2b, w3b, b3b) = raw_params
    D, H = w1a.shape
    F = 2 * H
    Fp = ((F + 127) // 128) * 128         # pad fused hidden width to a lane multiple
    pad = Fp - F
    bf16 = jnp.bfloat16

    # Layer 1: heads side-by-side along output features, transposed to (Fp, D).
    w1 = jnp.concatenate([w1a, w1b], axis=1)                               # (D, 2H)
    w1t = jnp.pad(w1, ((0, 0), (0, pad))).T.astype(bf16)                   # (Fp, D)
    b1t = jnp.pad(jnp.concatenate([b1a, b1b], axis=1), ((0, 0), (0, pad))).T  # (Fp, 1)

    # Layer 2: block-diagonal (in, out), transposed to (out, in).
    z = jnp.zeros((H, H), w2a.dtype)
    w2 = jnp.block([[w2a, z], [z, w2b]])                                   # (2H, 2H)
    w2t = jnp.pad(w2, ((0, pad), (0, pad))).T.astype(bf16)                 # (Fp, Fp)
    b2t = jnp.pad(jnp.concatenate([b2a, b2b], axis=1), ((0, 0), (0, pad))).T  # (Fp, 1)

    # Layer 3: block-diagonal (2H, 2), transposed to (2, Fp).
    w3 = jnp.concatenate(
        [jnp.concatenate([w3a, jnp.zeros_like(w3a)], axis=1),
         jnp.concatenate([jnp.zeros_like(w3b), w3b], axis=1)], axis=0)     # (2H, 2)
    w3t = jnp.pad(w3, ((0, pad), (0, 0))).T.astype(bf16)                   # (2, Fp)
    b3t = jnp.concatenate([b3a, b3b], axis=1).T                            # (2, 1)

    return (w1t, b1t.astype(jnp.float32),
            w2t, b2t.astype(jnp.float32),
            w3t, b3t.astype(jnp.float32))


def init_twinq_params(key, in_dim, hidden_dim):
    """Deterministic synthetic init mimicking nn.Linear (uniform +/- 1/sqrt(fan_in))."""
    dims = [in_dim, hidden_dim, hidden_dim, 1]

    def linear(key, fan_in, fan_out):
        kw, kb = jax.random.split(key)
        bound = 1.0 / jnp.sqrt(fan_in)
        w = jax.random.uniform(kw, (fan_in, fan_out), jnp.float32, -bound, bound)
        b = jax.random.uniform(kb, (1, fan_out), jnp.float32, -bound, bound)
        return w, b

    params = []
    keys = jax.random.split(key, 6)
    k = 0
    for _head in range(2):  # q1, q2
        for li in range(3):
            w, b = linear(keys[k], dims[li], dims[li + 1])
            params.extend([w, b])
            k += 1
    return tuple(params)


def _mlp_ref(x, w1, b1, w2, b2, w3, b3, *, bf16_cast):
    """One Q head; optionally mimics the kernel's bf16 weight/activation casts."""
    cast = (lambda a: a.astype(jnp.bfloat16)) if bf16_cast else (lambda a: a)
    h = jnp.dot(cast(x), cast(w1), preferred_element_type=jnp.float32) + b1
    h = jnp.maximum(h, 0.0)
    h = jnp.dot(cast(h), cast(w2), preferred_element_type=jnp.float32) + b2
    h = jnp.maximum(h, 0.0)
    q = jnp.dot(cast(h), cast(w3), preferred_element_type=jnp.float32) + b3
    return q[:, 0]


def twinq_reference(state, action, raw_params, *, bf16_cast=False):
    """Pure-JAX reference (unfused weights) for correctness checks."""
    sa = jnp.concatenate([state, action], axis=1)
    (w1a, b1a, w2a, b2a, w3a, b3a,
     w1b, b1b, w2b, b2b, w3b, b3b) = raw_params
    q1 = _mlp_ref(sa, w1a, b1a, w2a, b2a, w3a, b3a, bf16_cast=bf16_cast)
    q2 = _mlp_ref(sa, w1b, b1b, w2b, b2b, w3b, b3b, bf16_cast=bf16_cast)
    return jnp.minimum(q1, q2)


if __name__ == "__main__":
    key = jax.random.PRNGKey(0)
    k_s, k_a, k_p = jax.random.split(key, 3)

    batch = 200          # non-multiple of the tile -> exercises batch padding
    state_dim = 12
    action_dim = 4
    hidden_dim = 64      # 2*hidden = 128 lanes (real IQL default 256 -> 512, also aligned)

    state = jax.random.normal(k_s, (batch, state_dim), jnp.float32)
    action = jax.random.normal(k_a, (batch, action_dim), jnp.float32)
    raw = init_twinq_params(k_p, state_dim + action_dim, hidden_dim)
    packed = pack_twinq_params(raw)

    out = twinq_forward(state, action, packed, batch_tile=128)  # grid = 2 steps
    out = jax.block_until_ready(out)
    assert out.shape == (batch,)

    # Tight check against a precision-matched (bf16 weights/activations) reference.
    ref_bf16 = twinq_reference(state, action, raw, bf16_cast=True)
    assert jnp.allclose(out, ref_bf16, atol=2e-3, rtol=2e-3), "mismatch vs bf16 reference"

    # Loose check against the pure-f32 PyTorch-equivalent reference.
    ref_f32 = twinq_reference(state, action, raw, bf16_cast=False)
    assert jnp.allclose(out, ref_f32, atol=1e-1, rtol=1e-1), "mismatch vs f32 reference"

    print("KERNEL_OK")
</pallas_src>

<mosaic_0001>
module attributes {stable_mosaic.version = 11 : i64} {
  func.func @_twinq_kernel(%arg0: i32, %arg1: memref<16x128xbf16, #tpu.memory_space<vmem>>, %arg2: memref<128x16xbf16, #tpu.memory_space<vmem>>, %arg3: memref<128x1xf32, #tpu.memory_space<vmem>>, %arg4: memref<128x128xbf16, #tpu.memory_space<vmem>>, %arg5: memref<128x1xf32, #tpu.memory_space<vmem>>, %arg6: memref<2x128xbf16, #tpu.memory_space<vmem>>, %arg7: memref<2x1xf32, #tpu.memory_space<vmem>>, %arg8: memref<1x128xf32, #tpu.memory_space<vmem>>) attributes {dimension_semantics = [#tpu.dimension_semantics<parallel>], iteration_bounds = array<i64: 2>, scalar_prefetch = 0 : i64, scratch_operands = 0 : i64, tpu.core_type = #tpu.core_type<tc>, window_params = [{transform_indices = @transform_0, window_bounds = array<i64: 16, 128>}, {pipeline_mode = #tpu.pipeline_mode<synchronous>, transform_indices = @transform_1, window_bounds = array<i64: 128, 16>}, {pipeline_mode = #tpu.pipeline_mode<synchronous>, transform_indices = @transform_2, window_bounds = array<i64: 128, 1>}, {pipeline_mode = #tpu.pipeline_mode<synchronous>, transform_indices = @transform_3, window_bounds = array<i64: 128, 128>}, {pipeline_mode = #tpu.pipeline_mode<synchronous>, transform_indices = @transform_4, window_bounds = array<i64: 128, 1>}, {pipeline_mode = #tpu.pipeline_mode<synchronous>, transform_indices = @transform_5, window_bounds = array<i64: 2, 128>}, {pipeline_mode = #tpu.pipeline_mode<synchronous>, transform_indices = @transform_6, window_bounds = array<i64: 2, 1>}, {transform_indices = @transform_7, window_bounds = array<i64: 1, 128>}]} {
    %c0 = arith.constant 0 : index
    %c0_0 = arith.constant 0 : index
    %0 = vector.load %arg1[%c0, %c0_0] : memref<16x128xbf16, #tpu.memory_space<vmem>>, vector<16x128xbf16>
    %c0_1 = arith.constant 0 : index
    %c0_2 = arith.constant 0 : index
    %1 = vector.load %arg2[%c0_1, %c0_2] : memref<128x16xbf16, #tpu.memory_space<vmem>>, vector<128x16xbf16>
    %cst = arith.constant dense<0.000000e+00> : vector<128x128xf32>
    %2 = tpu.matmul %1, %0, %cst {dimension_numbers = #tpu.dot_dimension_numbers<[1], [0], [0], [1], [0, 0, 1, 1], [], []>} : vector<128x16xbf16>, vector<16x128xbf16>, vector<128x128xf32> -> vector<128x128xf32>
    %c0_3 = arith.constant 0 : index
    %c0_4 = arith.constant 0 : index
    %3 = vector.load %arg3[%c0_3, %c0_4] : memref<128x1xf32, #tpu.memory_space<vmem>>, vector<128x1xf32>
    %4 = vector.broadcast %3 : vector<128x1xf32> to vector<128x128xf32>
    %5 = arith.addf %2, %4 : vector<128x128xf32>
    %cst_5 = arith.constant 0.000000e+00 : f32
    %6 = vector.broadcast %cst_5 : f32 to vector<128x128xf32>
    %7 = arith.maximumf %5, %6 : vector<128x128xf32>
    %8 = arith.truncf %7 : vector<128x128xf32> to vector<128x128xbf16>
    %c0_6 = arith.constant 0 : index
    %c0_7 = arith.constant 0 : index
    %9 = vector.load %arg4[%c0_6, %c0_7] : memref<128x128xbf16, #tpu.memory_space<vmem>>, vector<128x128xbf16>
    %cst_8 = arith.constant dense<0.000000e+00> : vector<128x128xf32>
    %10 = tpu.matmul %9, %8, %cst_8 {dimension_numbers = #tpu.dot_dimension_numbers<[1], [0], [0], [1], [0, 0, 1, 1], [], []>} : vector<128x128xbf16>, vector<128x128xbf16>, vector<128x128xf32> -> vector<128x128xf32>
    %c0_9 = arith.constant 0 : index
    %c0_10 = arith.constant 0 : index
    %11 = vector.load %arg5[%c0_9, %c0_10] : memref<128x1xf32, #tpu.memory_space<vmem>>, vector<128x1xf32>
    %12 = vector.broadcast %11 : vector<128x1xf32> to vector<128x128xf32>
    %13 = arith.addf %10, %12 : vector<128x128xf32>
    %cst_11 = arith.constant 0.000000e+00 : f32
    %14 = vector.broadcast %cst_11 : f32 to vector<128x128xf32>
    %15 = arith.maximumf %13, %14 : vector<128x128xf32>
    %16 = arith.truncf %15 : vector<128x128xf32> to vector<128x128xbf16>
    %c0_12 = arith.constant 0 : index
    %c0_13 = arith.constant 0 : index
    %17 = vector.load %arg6[%c0_12, %c0_13] : memref<2x128xbf16, #tpu.memory_space<vmem>>, vector<2x128xbf16>
    %cst_14 = arith.constant dense<0.000000e+00> : vector<2x128xf32>
    %18 = tpu.matmul %17, %16, %cst_14 {dimension_numbers = #tpu.dot_dimension_numbers<[1], [0], [0], [1], [0, 0, 1, 1], [], []>} : vector<2x128xbf16>, vector<128x128xbf16>, vector<2x128xf32> -> vector<2x128xf32>
    %c0_15 = arith.constant 0 : index
    %c0_16 = arith.constant 0 : index
    %19 = vector.load %arg7[%c0_15, %c0_16] : memref<2x1xf32, #tpu.memory_space<vmem>>, vector<2x1xf32>
    %20 = vector.broadcast %19 : vector<2x1xf32> to vector<2x128xf32>
    %21 = arith.addf %18, %20 : vector<2x128xf32>
    %22 = vector.extract_strided_slice %21 {offsets = [0, 0], sizes = [1, 128], strides = [1, 1]} : vector<2x128xf32> to vector<1x128xf32>
    %23 = vector.extract_strided_slice %21 {offsets = [1, 0], sizes = [1, 128], strides = [1, 1]} : vector<2x128xf32> to vector<1x128xf32>
    %24 = arith.minimumf %22, %23 : vector<1x128xf32>
    %c0_17 = arith.constant 0 : index
    %c0_18 = arith.constant 0 : index
    %25 = vector.load %arg8[%c0_17, %c0_18] : memref<1x128xf32, #tpu.memory_space<vmem>>, vector<1x128xf32>
    tpu.vector_store %arg8[%c0_17, %c0_18], %24 {strides = array<i32>} : memref<1x128xf32, #tpu.memory_space<vmem>>, vector<1x128xf32>,
    return
  }
  func.func @transform_0(%arg0: i32) -> (i32, i32) {
    %c0_i32 = arith.constant 0 : i32
    %c0_i32_0 = arith.constant 0 : i32
    return %c0_i32, %arg0 : i32, i32
  }
  func.func @transform_1(%arg0: i32) -> (i32, i32) {
    %c0_i32 = arith.constant 0 : i32
    %c0_i32_0 = arith.constant 0 : i32
    %c0_i32_1 = arith.constant 0 : i32
    return %c0_i32, %c0_i32_0 : i32, i32
  }
  func.func @transform_2(%arg0: i32) -> (i32, i32) {
    %c0_i32 = arith.constant 0 : i32
    %c0_i32_0 = arith.constant 0 : i32
    %c0_i32_1 = arith.constant 0 : i32
    return %c0_i32, %c0_i32_0 : i32, i32
  }
  func.func @transform_3(%arg0: i32) -> (i32, i32) {
    %c0_i32 = arith.constant 0 : i32
    %c0_i32_0 = arith.constant 0 : i32
    %c0_i32_1 = arith.constant 0 : i32
    return %c0_i32, %c0_i32_0 : i32, i32
  }
  func.func @transform_4(%arg0: i32) -> (i32, i32) {
    %c0_i32 = arith.constant 0 : i32
    %c0_i32_0 = arith.constant 0 : i32
    %c0_i32_1 = arith.constant 0 : i32
    return %c0_i32, %c0_i32_0 : i32, i32
  }
  func.func @transform_5(%arg0: i32) -> (i32, i32) {
    %c0_i32 = arith.constant 0 : i32
    %c0_i32_0 = arith.constant 0 : i32
    %c0_i32_1 = arith.constant 0 : i32
    return %c0_i32, %c0_i32_0 : i32, i32
  }
  func.func @transform_6(%arg0: i32) -> (i32, i32) {
    %c0_i32 = arith.constant 0 : i32
    %c0_i32_0 = arith.constant 0 : i32
    %c0_i32_1 = arith.constant 0 : i32
    return %c0_i32, %c0_i32_0 : i32, i32
  }
  func.func @transform_7(%arg0: i32) -> (i32, i32) {
    %c0_i32 = arith.constant 0 : i32
    %c0_i32_0 = arith.constant 0 : i32
    return %c0_i32, %arg0 : i32, i32
  }
}

</mosaic_0001>

<bundles_post_ra>
// kernel: tpu_custom_call.1
= control target key start
LH: loop header
LB: loop body
LE: loop exit
PB: predicated region body
PF: predicated region fallthrough
CT: control target
= control target key end

     0   :  { %12 = vsyncpa [#allocation4], 0  ;;  %s1620_s0 = inlined_call_operand.vmem [shape: bf16[16,256], index: 0, kind: input, shape index: {}]   ;;  %s1621_s1 = inlined_call_operand.vmem [shape: bf16[128,16], index: 1, kind: input, shape index: {}]   ;;  %s1622_s2 = inlined_call_operand.vmem [shape: f32[128,1], index: 2, kind: input, shape index: {}]   ;;  %s1623_s3 = inlined_call_operand.vmem [shape: bf16[128,128], index: 3, kind: input, shape index: {}]   ;;  %s1624_s4 = inlined_call_operand.vmem [shape: f32[128,1], index: 4, kind: input, shape index: {}]   ;;  %s1625_s5 = inlined_call_operand.vmem [shape: bf16[2,128], index: 5, kind: input, shape index: {}]   ;;  %s1626_s6 = inlined_call_operand.vmem [shape: f32[2,1], index: 6, kind: input, shape index: {}]   ;;  %s1627_s7 = inlined_call_operand.hbm [shape: f32[1,256], index: 7, kind: output, shape index: {}]  }
   0x1   :  { %14 = vsyncpa [#allocation4 + $0x1], 0  ;;  %s1343_s24 = smov 0   ;;  %s1345_s25 = smov 0  }
   0x2   :  { %s1347_s26 = smov 0   ;;  %s1349_s27 = smov 0  }
   0x3 LB: > { %s1034_s28 = sadd.s32 4294967295, %s1297_s27   ;;  %s1035_s29 = sadd.s32 4294967294, %s1297_s27   ;;  %s1297_s27 = sphi %s1349_s27, %s1633_s27   ;;  %s1293_s26 = sphi %s1347_s26, %s1632_s26   ;;  %s1289_s25 = sphi %s1345_s25, %s1631_s25   ;;  %s1285_s24 = sphi %s1343_s24, %s1630_s24  }
   0x4   : > { %s1366_s30 = sadd.s32 1, %s1297_s27   ;;  %s27_s8 = sadd.s32 1, %s1293_s26 }
   0x5   : > { %s24_s9 = ssub.s32 %s1297_s27, %s1366_s30  ;;  %p34_p0 = scmp.ne.s32.totalorder %s1293_s26, %s1289_s25 }
   0x6   : > { %p25_p1 = scmp.eq.s32.totalorder %s24_s9, 0  ;;  %p35_p2 = scmp.eq.s32.totalorder %s1297_s27, 0 }
   0x7   : > { %p190_p3 = scmp.eq.s32.totalorder %s1034_s28, 1  ;;  %p195_p4 = scmp.ne.s32.totalorder %s1289_s25, %s1285_s24 }
   0x8   : > { %s1379_s10 = scalar_select %p25_p1, %s1293_s26, %s27_s8  }
   0x9   : > { %p36_p5 = por %p35_p2, %p34_p0  ;;  %p1381_p6 = por %p190_p3, %p34_p0 }
   0xa   : > { %p196_p7 = scmp.eq.s32.totalorder %s1035_s29, 1  ;;  %p1037_p9 = scmp.ge.s32.totalorder %s1297_s27, 2 }
   0xc   : > { %p1385_p8 = por %p196_p7, %p195_p4  ;;  %230 = sbr.rel (%p1037_p9) target bundleno = 26 (0x1a), region = 40 }
  0x13   : > { %233 = sbr.rel (!%p36_p5) target bundleno = 26 (0x1a), region = 44  ;;  %s235_s13 = sand.u32 (%p36_p5), 1, %s1293_s26  }
  0x14   : > { %s1039_s14 = sshll.u32 (%p36_p5), %s1297_s27, 2  ;;  %s1038_s15 = sshll.u32 (%p36_p5), %s235_s13, 3 }
  0x15   : > { %s239_s18 = scalar_lea.vmem (%p36_p5), %s1620_s0, %s1039_s14  ;;  %s237_s19 = scalar_lea.vmem (%p36_p5), [#allocation2], %s1038_s15 }
  0x16   : > { %v255_v0 = vld [vmem:[%s239_s18] sm:$0xf] (%p36_p5)  ;;  %v257_v1 = vld [vmem:[%s239_s18 + $0x8] sm:$0xf] (%p36_p5) }
  0x17   : > { %256 = vst [vmem:[%s237_s19] sm:$0xf] (%p36_p5), %v255_v0  ;;  %258 = vst [vmem:[%s237_s19 + $0x4] sm:$0xf] (%p36_p5), %v257_v1 }
  0x1a PF: > { %p1040_p10 = scmp.ge.s32.totalorder %s1297_s27, 1  ;;  %p284_p11 = scmp.lt.s32.totalorder %s1297_s27, 3 }
  0x1c   : > { %p285_p12 = pnand %p1040_p10, %p284_p11 }
  0x1d   : > { %s1400_s20 = sand.u32 (!%p285_p12), 1, %s1289_s25   ;;  %v1219_v2 = vld [vmem:[%s1621_s1] sm:$0xff] (!%p285_p12)   ;;  %vm482_vm0 = vcmask (!%p285_p12), 130048   ;;  %v1299_v4 = vmov (!%p285_p12), 0   ;;  %v1220_v5 = vld [vmem:[%s1621_s1 + $0x8] sm:$0xff] (!%p285_p12)   ;;  %v1221_v6 = vld [vmem:[%s1621_s1 + $0x10] sm:$0xff] (!%p285_p12)  }
  0x1e   : > { %288 = sbr.rel (%p285_p12) target bundleno = 774 (0x306), region = 85  ;;  %s1041_s23 = sshll.u32 (!%p285_p12), %s1400_s20, 3  ;;  %1106 = vmatprep.mubr.msk.bf16.mxu0 (!%p285_p12), %vm482_vm0, %v1219_v2  ;;  %1216 = vset.pattern.permute.xlu0 (!%p285_p12), %v1299_v4  ;;  %v340_v7 = vld [vmem:[%s1622_s2] sm:$0xff] (!%p285_p12)  ;;  %v341_v8 = vld [vmem:[%s1622_s2 + $0x8] sm:$0xff] (!%p285_p12)  ;;  %v342_v9 = vld [vmem:[%s1622_s2 + $0x10] sm:$0xff] (!%p285_p12)  ;;  %vm1301_vm1 = vmmov (!%p285_p12), 0  }
  0x1f   : > { %s293_s29 = scalar_lea.vmem (!%p285_p12), [#allocation2], %s1041_s23  ;;  %1217 = vset.pattern.permute.xlu1 (!%p285_p12), %v1299_v4  ;;  %358 = vperm.xlu0 (!%p285_p12), %1216, %v340_v7   ;;  %v343_v10 = vld [vmem:[%s1622_s2 + $0x18] sm:$0xff] (!%p285_p12)  ;;  %v344_v12 = vld [vmem:[%s1622_s2 + $0x20] sm:$0xff] (!%p285_p12)  ;;  %v345_v14 = vld [vmem:[%s1622_s2 + $0x28] sm:$0xff] (!%p285_p12)  ;;  %s1067_s18 = sshll.u32 (!%p285_p12), %s1034_s28, 4 }
  0x20   : > { %v1218_v3 = vld [vmem:[%s293_s29] sm:$0xff] (!%p285_p12)   ;;  %368 = vperm.xlu1 (!%p285_p12), %1217, %v342_v9   ;;  %v1222_v11 = vld [vmem:[%s1621_s1 + $0x18] sm:$0xff] (!%p285_p12)   ;;  %v346_v15 = vld [vmem:[%s1622_s2 + $0x30] sm:$0xff] (!%p285_p12)  ;;  %s320_s19 = scalar_lea.vmem (!%p285_p12), [#allocation3], %s1400_s20  ;;  %s1576_s29 = scalar_lea.hbm (!%p285_p12), %s1627_s7, %s1067_s18 }
  0x21   : > { %1104 = vmatprep.subr.bf16.mxu0 (!%p285_p12), %v1218_v3  ;;  %v1223_v13 = vld [vmem:[%s1621_s1 + $0x20] sm:$0xff] (!%p285_p12)   ;;  %v1224_v16 = vld [vmem:[%s1621_s1 + $0x28] sm:$0xff] (!%p285_p12)   ;;  %v1225_v18 = vld [vmem:[%s1621_s1 + $0x30] sm:$0xff] (!%p285_p12)   ;;  %s974_s21 = sshll.u32 (!%p285_p12), %s320_s19, 4  ;;  %s962_s8 = scalar_lea.sflag (!%p285_p12), [#allocation4], %s1400_s20  ;;  %s1578_s21 = int_to_ptr.vmem [resolvable:$true] %s974_s21 }
  0x22   : > { %1105 = vmatpush3.bf16.msra.mxu0 (!%p285_p12), %v1218_v3  ;;  %v348_v17 = vld [vmem:[%s1622_s2 + $0x40] sm:$0xff] (!%p285_p12)  ;;  %v347_v19 = vld [vmem:[%s1622_s2 + $0x38] sm:$0xff] (!%p285_p12)  ;;  %v349_v20 = vld [vmem:[%s1622_s2 + $0x48] sm:$0xff] (!%p285_p12)  ;;  %s1235_s9 = scalar_lea.vmem (!%p285_p12), %s1578_s21, 16  ;;  %s1302_s28 = smov (!%p285_p12), [#allocation3]  }
  0x23   : > { %363 = vperm.xlu0 (!%p285_p12), %1216, %v341_v8   ;;  %v350_v21 = vld [vmem:[%s1622_s2 + $0x50] sm:$0xff] (!%p285_p12)  ;;  %v351_v22 = vld [vmem:[%s1622_s2 + $0x58] sm:$0xff] (!%p285_p12)  ;;  %v352_v24 = vld [vmem:[%s1622_s2 + $0x60] sm:$0xff] (!%p285_p12)  ;;  %p1236_p13 = scmp.ne.s32.totalorder (!%p285_p12), %s1578_s21, %s1235_s9  ;;  %s1239_s13 = sshll.u32 (!%p285_p12), %s1302_s28, 4  ;;  %s1240_s13 = int_to_ptr.vmem [resolvable:$false] %s1239_s13 }
  0x24   : > { %373 = vperm.xlu1 (!%p285_p12), %1217, %v343_v10   ;;  %v1226_v23 = vld [vmem:[%s1621_s1 + $0x38] sm:$0xff] (!%p285_p12)   ;;  %v353_v25 = vld [vmem:[%s1622_s2 + $0x68] sm:$0xff] (!%p285_p12)  ;;  %v354_v26 = vld [vmem:[%s1622_s2 + $0x70] sm:$0xff] (!%p285_p12)  ;;  %s1241_s14 = scalar_lea.vmem (!%p285_p12), %s1240_s13, 32  ;;  %p1242_p2 = scmp.lt.s32.totalorder (!%p285_p12), %s1578_s21, %s1240_s13 }
  0x25   : > { %1107 = vmatmul.mubr.msk.bf16.vlgmr.msra.gmra.mrb[0].mxu0 %vm482_vm0, %v1220_v5  ;;  %v355_v27 = vld [vmem:[%s1622_s2 + $0x78] sm:$0xff]  ;;  %v644_v28 = vld [vmem:[%s1624_s4] sm:$0xff]  ;;  %v645_v29 = vld [vmem:[%s1624_s4 + $0x8] sm:$0xff]  ;;  %p1237_p0 = pnand %p1236_p13, %p1381_p6  ;;  %p1243_p3 = scmp.lt.s32.totalorder %s1241_s14, %s1235_s9 }
  0x26   : > { %1110 = vmatprep.mubr.msk.bf16.mxu0 %vm482_vm0, %v1221_v6  ;;  %v646_v30 = vld [vmem:[%s1624_s4 + $0x10] sm:$0xff]  ;;  %v647_v31 = vld [vmem:[%s1624_s4 + $0x18] sm:$0xff]  ;;  %v648_v32 = vld [vmem:[%s1624_s4 + $0x20] sm:$0xff] }
  0x27   : > { %378 = vperm.xlu0 %1216, %v344_v12   ;;  %v649_v33 = vld [vmem:[%s1624_s4 + $0x28] sm:$0xff]  ;;  %v650_v34 = vld [vmem:[%s1624_s4 + $0x30] sm:$0xff]  ;;  %v651_v35 = vld [vmem:[%s1624_s4 + $0x38] sm:$0xff]  ;;  %p1238_p1 = pneg %p1237_p0  ;;  %p1244_p4 = por %p1243_p3, %p1242_p2 }
  0x28   : > { %383 = vperm.xlu1 %1217, %v345_v14   ;;  %v652_v36 = vld [vmem:[%s1624_s4 + $0x40] sm:$0xff]  ;;  %v653_v37 = vld [vmem:[%s1624_s4 + $0x48] sm:$0xff]  ;;  %v654_v38 = vld [vmem:[%s1624_s4 + $0x50] sm:$0xff] }
  0x29   : > { %v655_v39 = vld [vmem:[%s1624_s4 + $0x58] sm:$0xff]  ;;  %v656_v40 = vld [vmem:[%s1624_s4 + $0x60] sm:$0xff]  ;;  %v657_v41 = vld [vmem:[%s1624_s4 + $0x68] sm:$0xff]  ;;  %p1245_p5 = pnand %p1244_p4, %p1238_p1 }
  0x2a   : > { %v658_v42 = vld [vmem:[%s1624_s4 + $0x70] sm:$0xff]  ;;  %v659_v43 = vld [vmem:[%s1624_s4 + $0x78] sm:$0xff]  ;;  %v910_v44 = vld [vmem:[%s1626_s6] sm:$0x3] }
  0x2b   : > { %388 = vperm.xlu0 %1216, %v346_v15   ;;  %v1227_v45 = vld [vmem:[%s1623_s3] sm:$0xff]  }
  0x2c   : > { %393 = vperm.xlu1 %1217, %v347_v19   ;;  %1138 = vmatprep.mubr.bf16.mxu1 %v1227_v45 }
  0x2d   : > { %1111 = vmatmul.mubr.msk.bf16.gmra.mrb[4].mxu0 %vm482_vm0, %v1222_v11 }
  0x2e   : > { %1114 = vmatprep.mubr.msk.bf16.mxu0 %vm482_vm0, %v1223_v13 }
  0x2f   : > { %398 = vperm.xlu0 %1216, %v348_v17  }
  0x30   : > { %403 = vperm.xlu1 %1217, %v349_v20  }
  0x33   : > { %408 = vperm.xlu0 %1216, %v350_v21  }
  0x34   : > { %413 = vperm.xlu1 %1217, %v351_v22  }
  0x35   : > { %1115 = vmatmul.mubr.msk.bf16.gmra.mrb[8].mxu0 %vm482_vm0, %v1224_v16 }
  0x36   : > { %1118 = vmatprep.mubr.msk.bf16.mxu0 %vm482_vm0, %v1225_v18 }
  0x37   : > { %418 = vperm.xlu0 %1216, %v352_v24  }
  0x38   : > { %423 = vperm.xlu1 %1217, %v353_v25  }
  0x3b   : > { %428 = vperm.xlu0 %1216, %v354_v26  }
  0x3c   : > { %433 = vperm.xlu1 %1217, %v355_v27  }
  0x3d   : > { %1119 = vmatmul.mubr.msk.bf16.gmra.mrb[12].mxu0 %vm482_vm0, %v1226_v23 }
  0x3f   : > { %662 = vperm.xlu0 %1216, %v644_v28  }
  0x40   : > { %667 = vperm.xlu1 %1217, %v645_v29  }
  0x43   : > { %672 = vperm.xlu0 %1216, %v646_v30  }
  0x44   : > { %677 = vperm.xlu1 %1217, %v647_v31  }
  0x47   : > { %682 = vperm.xlu0 %1216, %v648_v32  }
  0x48   : > { %687 = vperm.xlu1 %1217, %v649_v33  }
  0x4b   : > { %692 = vperm.xlu0 %1216, %v650_v34  }
  0x4c   : > { %697 = vperm.xlu1 %1217, %v651_v35  }
  0x4f   : > { %702 = vperm.xlu0 %1216, %v652_v36  }
  0x50   : > { %707 = vperm.xlu1 %1217, %v653_v37  }
  0x53   : > { %712 = vperm.xlu0 %1216, %v654_v38  }
  0x54   : > { %717 = vperm.xlu1 %1217, %v655_v39  }
  0x57   : > { %722 = vperm.xlu0 %1216, %v656_v40  }
  0x58   : > { %727 = vperm.xlu1 %1217, %v657_v41  }
  0x5b   : > { %732 = vperm.xlu0 %1216, %v658_v42  }
  0x5c   : > { %737 = vperm.xlu1 %1217, %v659_v43  }
  0x5f   : > { %913 = vperm.xlu0 %1216, %v910_v44  }
  0x9e   : > { %v359_v46 = vpop.permute.xlu0 %358 }
  0x9f   : > { %v369_v47 = vpop.permute.xlu1 %368 }
  0xa2   : > { %v364_v48 = vpop.permute.xlu0 %363 }
  0xa3   : > { %v374_v49 = vpop.permute.xlu1 %373 }
  0xa6   : > { %v379_v50 = vpop.permute.xlu0 %378 }
  0xa7   : > { %v384_v51 = vpop.permute.xlu1 %383 }
  0xaa   : > { %v389_v52 = vpop.permute.xlu0 %388 }
  0xab   : > { %v394_v56 = vpop.permute.xlu1 %393 }
  0xae   : > { %v399_v0 = vpop.permute.xlu0 %398 }
  0xaf   : > { %v404_v4 = vpop.permute.xlu1 %403 }
  0xb2   : > { %v409_v13 = vpop.permute.xlu0 %408 }
  0xb3   : > { %v414_v17 = vpop.permute.xlu1 %413 }
  0xb6   : > { %v419_v25 = vpop.permute.xlu0 %418 }
  0xb7   : > { %v424_v30 = vpop.permute.xlu1 %423 }
  0xba   : > { %v429_v37 = vpop.permute.xlu0 %428 }
  0xbb   : > { %v434_v42 = vpop.permute.xlu1 %433 }
  0xf8   : > { %v1108_v53 = vpop.f32.mrb[0].mxu0 }
  0xf9   : > { %v550_v54 = vadd.f32 %v1108_v53, %v369_v47  ;;  %v541_v55 = vpop.f32.mrb[1].mxu0 }
  0xfa   : > { %v542_v57 = vadd.f32 %v541_v55, %v359_v46  ;;  %v1109_v58 = vpop.f32.mrb[2].mxu0  ;;  %v1229_v55 = vld [vmem:[%s1623_s3 + $0x10] sm:$0xff]  }
  0xfb   : > { %v553_v59 = vadd.f32 %v1109_v58, %v374_v49  ;;  %v544_v60 = vpop.f32.mrb[3].mxu0  ;;  %v606_v62 = vmax.f32 %v550_v54, 0.0  ;;  %v1228_v54 = vld [vmem:[%s1623_s3 + $0x8] sm:$0xff]  }
  0xfc   : > { %v545_v61 = vadd.f32 %v544_v60, %v364_v48  ;;  %v604_v1 = vmax.f32 %v542_v57, 0.0  ;;  %v1231_v57 = vld [vmem:[%s1623_s3 + $0x20] sm:$0xff]   ;;  %v1232_v58 = vld [vmem:[%s1623_s3 + $0x28] sm:$0xff]   ;;  %v1234_v60 = vld [vmem:[%s1623_s3 + $0x38] sm:$0xff]  }
  0xfd   : > { %v607_v63 = vmax.f32 %v553_v59, 0.0  ;;  %v1233_v59 = vld [vmem:[%s1623_s3 + $0x30] sm:$0xff]  }
  0xfe   : > { %v605_v2 = vmax.f32 %v545_v61, 0.0  ;;  %v1300_v61 = vmov 0.0  }
  0xff   : > { %v621_v3 = vpack.c.bf16 %v607_v63, %v606_v62  ;;  %1154 = vmatprep.subr.bf16.mxu0 %v1300_v61  ;;  %1170 = vmatprep.mubr.msk.bf16.mxu0 %vm1301_vm1, %v1300_v61  ;;  %v663_v62 = vpop.permute.xlu0 %662  ;;  %v668_v63 = vpop.permute.xlu1 %667 }
 0x100   : > { %v1112_v5 = vpop.f32.mrb[4].mxu0  ;;  %v620_v6 = vpack.c.bf16 %v605_v2, %v604_v1 }
 0x101   : > { %v566_v7 = vadd.f32 %v1112_v5, %v389_v52  ;;  %v557_v8 = vpop.f32.mrb[5].mxu0 }
 0x102   : > { %v558_v9 = vadd.f32 %v557_v8, %v379_v50  ;;  %v1113_v10 = vpop.f32.mrb[6].mxu0  ;;  %1122 = vmatprep.subr.bf16.mxu1 %v620_v6 }
 0x103   : > { %v569_v11 = vadd.f32 %v1113_v10, %v394_v56  ;;  %v560_v12 = vpop.f32.mrb[7].mxu0  ;;  %1123 = vmatpush3.bf16.msra.mxu1 %v620_v6  ;;  %v610_v15 = vmax.f32 %v566_v7, 0.0  ;;  %v1230_v56 = vld [vmem:[%s1623_s3 + $0x18] sm:$0xff]   ;;  %v678_v1 = vpop.permute.xlu1 %677 }
 0x104   : > { %v561_v14 = vadd.f32 %v560_v12, %v384_v51  ;;  %1124 = vmatprep.subr.bf16.mxu1 %v621_v3  ;;  %v608_v18 = vmax.f32 %v558_v9, 0.0 }
 0x105   : > { %v611_v16 = vmax.f32 %v569_v11, 0.0 }
 0x106   : > { %v609_v19 = vmax.f32 %v561_v14, 0.0 }
 0x107   : > { %v623_v20 = vpack.c.bf16 %v611_v16, %v610_v15  ;;  %1125 = vmatpush3.bf16.msra.mxu1 %v621_v3  ;;  %v688_v3 = vpop.permute.xlu1 %687 }
 0x108   : > { %v622_v21 = vpack.c.bf16 %v609_v19, %v608_v18  ;;  %v1116_v22 = vpop.f32.mrb[8].mxu0 }
 0x109   : > { %v582_v23 = vadd.f32 %v1116_v22, %v409_v13  ;;  %v573_v24 = vpop.f32.mrb[9].mxu0 }
 0x10a   : > { %v574_v26 = vadd.f32 %v573_v24, %v399_v0  ;;  %v1117_v27 = vpop.f32.mrb[10].mxu0  ;;  %1126 = vmatprep.subr.bf16.mxu1 %v622_v21  ;;  %v673_v0 = vpop.permute.xlu0 %672 }
 0x10b   : > { %v585_v28 = vadd.f32 %v1117_v27, %v414_v17  ;;  %v576_v29 = vpop.f32.mrb[11].mxu0  ;;  %1127 = vmatpush3.bf16.msra.mxu1 %v622_v21  ;;  %v614_v32 = vmax.f32 %v582_v23, 0.0  ;;  %v698_v8 = vpop.permute.xlu1 %697 }
 0x10c   : > { %v577_v31 = vadd.f32 %v576_v29, %v404_v4  ;;  %1128 = vmatprep.subr.bf16.mxu1 %v623_v20  ;;  %v612_v34 = vmax.f32 %v574_v26, 0.0 }
 0x10d   : > { %v615_v33 = vmax.f32 %v585_v28, 0.0 }
 0x10e   : > { %v613_v35 = vmax.f32 %v577_v31, 0.0  ;;  %v683_v2 = vpop.permute.xlu0 %682 }
 0x10f   : > { %v625_v36 = vpack.c.bf16 %v615_v33, %v614_v32  ;;  %1129 = vmatpush3.bf16.msra.mxu1 %v623_v20  ;;  %v708_v20 = vpop.permute.xlu1 %707 }
 0x110   : > { %v624_v38 = vpack.c.bf16 %v613_v35, %v612_v34  ;;  %v1120_v39 = vpop.f32.mrb[12].mxu0 }
 0x111   : > { %v598_v40 = vadd.f32 %v1120_v39, %v429_v37  ;;  %v589_v41 = vpop.f32.mrb[13].mxu0 }
 0x112   : > { %v590_v43 = vadd.f32 %v589_v41, %v419_v25  ;;  %v1121_v44 = vpop.f32.mrb[14].mxu0  ;;  %1130 = vmatprep.subr.bf16.mxu1 %v624_v38  ;;  %v693_v4 = vpop.permute.xlu0 %692 }
 0x113   : > { %v601_v45 = vadd.f32 %v1121_v44, %v434_v42  ;;  %v592_v46 = vpop.f32.mrb[15].mxu0  ;;  %1131 = vmatpush3.bf16.msra.mxu1 %v624_v38  ;;  %v618_v48 = vmax.f32 %v598_v40, 0.0  ;;  %v718_v33 = vpop.permute.xlu1 %717 }
 0x114   : > { %v593_v47 = vadd.f32 %v592_v46, %v424_v30  ;;  %1132 = vmatprep.subr.bf16.mxu1 %v625_v36  ;;  %v616_v50 = vmax.f32 %v590_v43, 0.0 }
 0x115   : > { %v619_v49 = vmax.f32 %v601_v45, 0.0 }
 0x116   : > { %v617_v51 = vmax.f32 %v593_v47, 0.0  ;;  %v703_v16 = vpop.permute.xlu0 %702 }
 0x117   : > { %v627_v52 = vpack.c.bf16 %v619_v49, %v618_v48  ;;  %1133 = vmatpush3.bf16.msra.mxu1 %v625_v36  ;;  %v728_v46 = vpop.permute.xlu1 %727 }
 0x118   : > { %v626_v53 = vpack.c.bf16 %v617_v51, %v616_v50 }
 0x11a   : > { %1134 = vmatprep.subr.bf16.mxu1 %v626_v53  ;;  %v713_v29 = vpop.permute.xlu0 %712 }
 0x11b   : > { %1135 = vmatpush3.bf16.msra.mxu1 %v626_v53 }
 0x11c   : > { %1136 = vmatprep.subr.bf16.mxu1 %v627_v52 }
 0x11e   : > { %v723_v41 = vpop.permute.xlu0 %722 }
 0x11f   : > { %1137 = vmatpush3.bf16.msra.mxu1 %v627_v52 }
 0x122   : > { %1139 = vmatmul.mubr.bf16.vlgmr.msra.gmra.mrb[0].mxu1 %v1228_v54  ;;  %v733_v53 = vpop.permute.xlu0 %732 }
 0x123   : > { %1142 = vmatprep.mubr.bf16.mxu1 %v1229_v55 }
 0x12a   : > { %1143 = vmatmul.mubr.bf16.gmra.mrb[4].mxu1 %v1230_v56 }
 0x12b   : > { %1146 = vmatprep.mubr.bf16.mxu1 %v1231_v57 }
 0x132   : > { %1147 = vmatmul.mubr.bf16.gmra.mrb[8].mxu1 %v1232_v58  ;;  %v738_v58 = vpop.permute.xlu1 %737 }
 0x133   : > { %1150 = vmatprep.mubr.bf16.mxu1 %v1233_v59 }
 0x13a   : > { %1151 = vmatmul.mubr.bf16.gmra.mrb[12].mxu1 %v1234_v60 }
 0x1f5   : > { %v1140_v5 = vpop.f32.mrb[0].mxu1 }
 0x1f6   : > { %v831_v6 = vadd.f32 %v1140_v5, %v673_v0  ;;  %v822_v7 = vpop.f32.mrb[1].mxu1 }
 0x1f7   : > { %v823_v9 = vadd.f32 %v822_v7, %v663_v62  ;;  %v1141_v10 = vpop.f32.mrb[2].mxu1  ;;  %v909_v7 = vld [vmem:[%s1625_s5] sm:$0x1] }
 0x1f8   : > { %v834_v11 = vadd.f32 %v1141_v10, %v678_v1  ;;  %v825_v12 = vpop.f32.mrb[3].mxu1  ;;  %v887_v14 = vmax.f32 %v831_v6, 0.0 }
 0x1f9   : > { %v826_v13 = vadd.f32 %v825_v12, %v668_v63  ;;  %v885_v17 = vmax.f32 %v823_v9, 0.0 }
 0x1fa   : > { %v888_v15 = vmax.f32 %v834_v11, 0.0 }
 0x1fb   : > { %v886_v18 = vmax.f32 %v826_v13, 0.0 }
 0x1fc   : > { %v902_v19 = vpack.c.bf16 %v888_v15, %v887_v14 }
 0x1fd   : > { %v901_v21 = vpack.c.bf16 %v886_v18, %v885_v17  ;;  %v1144_v22 = vpop.f32.mrb[4].mxu1 }
 0x1fe   : > { %v847_v23 = vadd.f32 %v1144_v22, %v693_v4  ;;  %v838_v24 = vpop.f32.mrb[5].mxu1 }
 0x1ff   : > { %v839_v25 = vadd.f32 %v838_v24, %v683_v2  ;;  %v1145_v26 = vpop.f32.mrb[6].mxu1  ;;  %1155 = vmatpush3.bf16.msra.mxu0 %v901_v21 }
 0x200   : > { %v850_v27 = vadd.f32 %v1145_v26, %v698_v8  ;;  %v841_v28 = vpop.f32.mrb[7].mxu1  ;;  %1156 = vmatprep.subr.bf16.mxu0 %v1300_v61  ;;  %v891_v31 = vmax.f32 %v847_v23, 0.0  ;;  %v914_v8 = vpop.permute.xlu0 %913 }
 0x201   : > { %v842_v30 = vadd.f32 %v841_v28, %v688_v3  ;;  %v889_v34 = vmax.f32 %v839_v25, 0.0 }
 0x202   : > { %v892_v32 = vmax.f32 %v850_v27, 0.0 }
 0x203   : > { %v890_v35 = vmax.f32 %v842_v30, 0.0  ;;  %1157 = vmatpush3.bf16.msra.mxu0 %v902_v19 }
 0x204   : > { %v904_v36 = vpack.c.bf16 %v892_v32, %v891_v31  ;;  %1158 = vmatprep.subr.bf16.mxu0 %v1300_v61 }
 0x205   : > { %v903_v37 = vpack.c.bf16 %v890_v35, %v889_v34  ;;  %v1148_v38 = vpop.f32.mrb[8].mxu1 }
 0x206   : > { %v863_v39 = vadd.f32 %v1148_v38, %v713_v29  ;;  %v854_v40 = vpop.f32.mrb[9].mxu1 }
 0x207   : > { %v855_v42 = vadd.f32 %v854_v40, %v703_v16  ;;  %v1149_v43 = vpop.f32.mrb[10].mxu1  ;;  %1159 = vmatpush3.bf16.msra.mxu0 %v903_v37 }
 0x208   : > { %v866_v44 = vadd.f32 %v1149_v43, %v718_v33  ;;  %v857_v45 = vpop.f32.mrb[11].mxu1  ;;  %1160 = vmatprep.subr.bf16.mxu0 %v1300_v61  ;;  %v895_v48 = vmax.f32 %v863_v39, 0.0 }
 0x209   : > { %v858_v47 = vadd.f32 %v857_v45, %v708_v20  ;;  %v893_v50 = vmax.f32 %v855_v42, 0.0 }
 0x20a   : > { %v896_v49 = vmax.f32 %v866_v44, 0.0 }
 0x20b   : > { %v894_v51 = vmax.f32 %v858_v47, 0.0  ;;  %1161 = vmatpush3.bf16.msra.mxu0 %v904_v36 }
 0x20c   : > { %v906_v52 = vpack.c.bf16 %v896_v49, %v895_v48  ;;  %1162 = vmatprep.subr.bf16.mxu0 %v1300_v61 }
 0x20d   : > { %v905_v54 = vpack.c.bf16 %v894_v51, %v893_v50  ;;  %v1152_v55 = vpop.f32.mrb[12].mxu1 }
 0x20e   : > { %v879_v56 = vadd.f32 %v1152_v55, %v733_v53  ;;  %v870_v57 = vpop.f32.mrb[13].mxu1 }
 0x20f   : > { %v871_v59 = vadd.f32 %v870_v57, %v723_v41  ;;  %v1153_v60 = vpop.f32.mrb[14].mxu1  ;;  %1163 = vmatpush3.bf16.msra.mxu0 %v905_v54 }
 0x210   : > { %v882_v62 = vadd.f32 %v1153_v60, %v738_v58  ;;  %v873_v63 = vpop.f32.mrb[15].mxu1  ;;  %1164 = vmatprep.subr.bf16.mxu0 %v1300_v61  ;;  %v899_v1 = vmax.f32 %v879_v56, 0.0 }
 0x211   : > { %v874_v0 = vadd.f32 %v873_v63, %v728_v46  ;;  %v897_v3 = vmax.f32 %v871_v59, 0.0 }
 0x212   : > { %v900_v2 = vmax.f32 %v882_v62, 0.0 }
 0x213   : > { %v898_v4 = vmax.f32 %v874_v0, 0.0  ;;  %1165 = vmatpush3.bf16.msra.mxu0 %v906_v52 }
 0x214   : > { %v908_v5 = vpack.c.bf16 %v900_v2, %v899_v1  ;;  %1166 = vmatprep.subr.bf16.mxu0 %v1300_v61 }
 0x215   : > { %v907_v6 = vpack.c.bf16 %v898_v4, %v897_v3 }
 0x217   : > { %1167 = vmatpush3.bf16.msra.mxu0 %v907_v6 }
 0x218   : > { %1168 = vmatprep.subr.bf16.mxu0 %v1300_v61 }
 0x21b   : > { %1169 = vmatpush3.bf16.msra.mxu0 %v908_v5 }
 0x21e   : > { %1171 = vmatmul.mubr.bf16.vlgmr.msra.gmra.mrb[16].mxu0 %v909_v7 }
 0x2f1   : > { %v950_v9 = vpop.f32.mrb[16].mxu0 }
 0x2f2   : > { %v951_v10 = vadd.f32 %v950_v9, %v914_v8  ;;  %v1172_v11 = vpop.f32.mrb[17].mxu0 }
 0x2f3   : > { %v953_v12 = vpop.f32.mrb[18].mxu0 }
 0x2f4   : > { %v957_v13 = vrot.slane %v951_v10, 1  ;;  %v1173_v14 = vpop.f32.mrb[19].mxu0 }
 0x2f6   : > { %v959_v61 = vmin.f32 %v951_v10, %v957_v13 }
 0x2f8   : > { %960 = vst [vmem:[%s320_s19] sm:$0x1] %v959_v61 }
 0x2f9   : > { %1248 = shalt.err (!%p1245_p5)
}
 0x2fa   : > { %s1249_s20 = scalar_lea.hbm %s1576_s29, 16  ;;  %s1253_s17 = scalar_lea.hbm %s1627_s7, 32 }
 0x2fb   : > { %p1250_p7 = scmp.ne.s32.totalorder %s1576_s29, %s1249_s20  ;;  %p1254_p12 = scmp.lt.u32.totalorder %s1576_s29, %s1627_s7 }
 0x2fc   : > { %p1255_p13 = scmp.lt.u32.totalorder %s1253_s17, %s1249_s20  ;;  %p1257_p1 = scmp.lt.u32.totalorder %s1249_s20, %s1576_s29 }
 0x2fd   : > { %p1251_p10 = pnand %p1250_p7, %p1381_p6 }
 0x2fe   : > { %p1256_p0 = por %p1255_p13, %p1254_p12 }
 0x2ff   : > { %p1252_p11 = pneg %p1251_p10 }
 0x300   : > { %p1258_p2 = por %p1257_p1, %p1256_p0 }
 0x302   : > { %p1259_p3 = pnand %p1258_p2, %p1252_p11 }
 0x304   : > { %1262 = shalt.err (!%p1259_p3)
}
 0x305   : > { %1174 = dma.vmem_to_hbm [thread:$0]  (%p1381_p6), %s1578_s21, 16, %s1576_s29, %s962_s8  }
 0x306 PF: > { %s986_s22 = sand.u32 1, %s1285_s24   ;;  %p1177_p4 = pnand %p1037_p9, %p1385_p8 }
 0x307   : > { %s987_s23 = scalar_lea.sflag [#allocation4], %s986_s22 }
 0x308   : > { %1280 = dma.done.wait (!%p1177_p4), %s987_s23, 16  }
 0x309   : > { %1282 = vsyncadd (!%p1177_p4), %s987_s23, 4294967280  ;;  %p17_p5 = scmp.ge.s32.totalorder %s1366_s30, 4   ;;  %s1630_s24 = smov %s1289_s25 }
 0x30a   : > { %s1631_s25 = smov %s1293_s26  ;;  %s1632_s26 = smov %s1379_s10 }
 0x30b   : > { %s1633_s27 = smov %s1366_s30  ;;  %19 = sbr.rel (!%p17_p5) target bundleno = 3 (0x3), region = 129 }
 0x312   :  { %991 = vsyncpa [#allocation4], 1 }
 0x313   :  { %993 = vsyncpa [#allocation4 + $0x1], 1 }

</bundles_post_ra>
